<compile_context>
chip_gen: v5e
topology: v5e:2x2
jax: 0.10.0
libtpu: 0.0.40
codegen_flags: <defaults>
</compile_context>

<pallas_src>
import functools

import jax
import jax.numpy as jnp
import numpy as np
from jax.experimental import pallas as pl
from jax.experimental.pallas import tpu as pltpu

_LANE = 128


def _soft_dice_partials_kernel(x_ref, y_ref, tp_ref, sx_ref, sy_ref, *, num_classes):
    """Accumulate per-(batch, channel) partial sums over the spatial grid axis.

    x_ref  : (C, TR, 128)   net-output tile (any float dtype; accumulated in f32)
    y_ref  : (TR, 128)      int32 label tile (values >= num_classes act as padding)
    tp_ref : (C, 1, 128)    Σ x*onehot   (lane-wise partials, resident per batch b)
    sx_ref : (C, 1, 128)    Σ x
    sy_ref : (C, 1, 128)    Σ onehot     (per-class label counts)
    """
    s = pl.program_id(1)

    @pl.when(s == 0)
    def _init():
        tp_ref[...] = jnp.zeros_like(tp_ref)
        sx_ref[...] = jnp.zeros_like(sx_ref)
        sy_ref[...] = jnp.zeros_like(sy_ref)

    y = y_ref[...]  # (TR, 128) int32

    # C is small and static -> unrolled per-channel loop, all ops are clean 2-D
    # (TR, 128) elementwise + sublane reductions; the cross-lane reduce happens
    # only once, in the wrapper epilogue.
    for c in range(num_classes):
        xc = x_ref[c].astype(jnp.float32)        # (TR, 128)
        mf = (y == c).astype(jnp.float32)        # (TR, 128) in-kernel one-hot
        tp_ref[c] += jnp.sum(xc * mf, axis=0, keepdims=True)   # (1, 128)
        sx_ref[c] += jnp.sum(xc, axis=0, keepdims=True)
        sy_ref[c] += jnp.sum(mf, axis=0, keepdims=True)


def _pick_row_tile(s_rows, num_channels, x_itemsize, budget_bytes=2 * 1024 * 1024):
    """Pick TR (sublane rows of 128 lanes per block).

    Returns (tr, pad_rows).  tr is either the full spatial extent, or a multiple of 8
    dividing it, keeping one x block around `budget_bytes` (inputs are double-buffered
    by Pallas, so this stays far below even v5e's 16 MiB scoped-VMEM default).
    """
    max_tr = max(8, budget_bytes // (num_channels * _LANE * x_itemsize))
    if s_rows <= max_tr:
        return s_rows, 0                      # one spatial block (full dim -> always legal)
    start = min(s_rows, max_tr)
    start -= start % 8
    for tr in range(start, 7, -8):
        if s_rows % tr == 0:
            return tr, 0                      # multiple of 8 dividing S -> no pad needed
    # pathological spatial extent: pad rows up to a multiple of `start`
    return start, (-s_rows) % start


def soft_dice_loss_git(x, y, smooth=1.0):
    """Forward of SoftDiceLoss_git with default ctor args.

    x: (B, C, H, W) float net output (apply_nonlin=None -> used as-is)
    y: (B, H, W) int label map, (B, 1, H, W), or hard one-hot (B, C, H, W)
    returns: scalar float32 loss
    """
    B, C, H, W = x.shape

    # ---- glue: obtain an int label map (mirrors the torch scatter_ path) ----
    if y.ndim == x.ndim and y.shape == x.shape:
        # TODO(synk): soft one-hot gt passthrough is not kernelized; assumes hard one-hot.
        y = jnp.argmax(y, axis=1)
    elif y.ndim == x.ndim:
        y = y[:, 0]
    y = y.astype(jnp.int32)                   # (B, H, W)

    hw = H * W
    s_rows = (hw + _LANE - 1) // _LANE
    tr, pad_rows = _pick_row_tile(s_rows, C, int(jnp.dtype(x.dtype).itemsize))
    s_total = s_rows + pad_rows
    hw_pad = s_total * _LANE

    # contiguous reshapes (views) -- no channel-major transpose pass over HBM
    xf = x.reshape(B, C, hw)
    yf = y.reshape(B, hw)
    if hw_pad != hw:
        # only hit when H*W is not lane/tile aligned (typical segmentation shapes are):
        # x padded with 0 (adds nothing), y padded with C (matches no class)
        xf = jnp.pad(xf, ((0, 0), (0, 0), (0, hw_pad - hw)))
        yf = jnp.pad(yf, ((0, 0), (0, hw_pad - hw)), constant_values=C)
    x4 = xf.reshape(B, C, s_total, _LANE)
    y3 = yf.reshape(B, s_total, _LANE)

    n_s = s_total // tr
    grid = (B, n_s)

    kernel = functools.partial(_soft_dice_partials_kernel, num_classes=C)
    part_shape = jax.ShapeDtypeStruct((B, C, 1, _LANE), jnp.float32)
    out_spec = pl.BlockSpec((None, C, 1, _LANE), lambda b, s: (b, 0, 0, 0))

    cost = pl.CostEstimate(
        flops=3 * B * C * hw,
        transcendentals=0,
        bytes_accessed=int(x4.size) * int(jnp.dtype(x4.dtype).itemsize)
        + int(y3.size) * 4
        + 3 * B * C * _LANE * 4,
    )

    tp_p, sx_p, sy_p = pl.pallas_call(
        kernel,
        out_shape=(part_shape, part_shape, part_shape),
        grid_spec=pltpu.PrefetchScalarGridSpec(
            num_scalar_prefetch=0,
            grid=grid,
            in_specs=[
                pl.BlockSpec((None, C, tr, _LANE), lambda b, s: (b, 0, s, 0)),
                pl.BlockSpec((None, tr, _LANE), lambda b, s: (b, s, 0)),
            ],
            out_specs=[out_spec, out_spec, out_spec],
        ),
        compiler_params=pltpu.CompilerParams(
            dimension_semantics=("parallel", "arbitrary"),
        ),
        cost_estimate=cost,
    )(x4, y3)

    # ---- tiny epilogue on the (B, C, 128) partials ----
    tp = jnp.sum(tp_p, axis=(0, 2, 3))        # (C,)  batch_dice=True folds batch too
    sx = jnp.sum(sx_p, axis=(0, 2, 3))
    sy = jnp.sum(sy_p, axis=(0, 2, 3))
    fp = sx - tp                              # Σ x*(1-y)
    fn = sy - tp                              # Σ (1-x)*y
    dc = (2.0 * tp + smooth) / (2.0 * tp + fp + fn + smooth)
    # dc_log=True, do_bg=True -> loss = mean over all channels of -log(dc)
    return jnp.mean(-jnp.log(dc)).astype(jnp.float32)


def _reference_loss(x, y, smooth=1.0):
    """Pure-jnp reference mirroring the PyTorch forward (default ctor args)."""
    B, C, H, W = x.shape
    y_onehot = jax.nn.one_hot(y.astype(jnp.int32), C, axis=1, dtype=x.dtype)
    axes = (0, 2, 3)  # batch_dice=True
    tp = jnp.sum(x * y_onehot, axis=axes)
    fp = jnp.sum(x * (1 - y_onehot), axis=axes)
    fn = jnp.sum((1 - x) * y_onehot, axis=axes)
    dc = (2 * tp + smooth) / (2 * tp + fp + fn + smooth)
    return jnp.mean(-jnp.log(dc))


if __name__ == "__main__":
    key = jax.random.PRNGKey(0)
    k1, k2 = jax.random.split(key)

    B, C, H, W = 2, 4, 16, 16
    # net output: probabilities in [0,1] (apply_nonlin=None, so passed as-is)
    x = jax.random.uniform(k1, (B, C, H, W), dtype=jnp.float32)
    # ground-truth label map
    y = jax.random.randint(k2, (B, H, W), 0, C, dtype=jnp.int32)

    loss = jax.block_until_ready(soft_dice_loss_git(x, y, smooth=1.0))
    ref = jax.block_until_ready(_reference_loss(x, y, smooth=1.0))

    assert np.allclose(np.asarray(loss), np.asarray(ref), rtol=1e-5, atol=1e-5), (loss, ref)
    print("KERNEL_OK")
</pallas_src>

<mosaic_0001>
module attributes {stable_mosaic.version = 11 : i64} {
  func.func @_soft_dice_partials_kernel(%arg0: i32, %arg1: i32, %arg2: memref<1x4x2x128xf32, #tpu.memory_space<vmem>>, %arg3: memref<1x2x128xi32, #tpu.memory_space<vmem>>, %arg4: memref<1x4x1x128xf32, #tpu.memory_space<vmem>>, %arg5: memref<1x4x1x128xf32, #tpu.memory_space<vmem>>, %arg6: memref<1x4x1x128xf32, #tpu.memory_space<vmem>>) attributes {dimension_semantics = [#tpu.dimension_semantics<parallel>, #tpu.dimension_semantics<arbitrary>], iteration_bounds = array<i64: 2, 1>, scalar_prefetch = 0 : i64, scratch_operands = 0 : i64, tpu.core_type = #tpu.core_type<tc>, window_params = [{transform_indices = @transform_0, window_bounds = array<i64: 1, 4, 2, 128>}, {transform_indices = @transform_1, window_bounds = array<i64: 1, 2, 128>}, {transform_indices = @transform_2, window_bounds = array<i64: 1, 4, 1, 128>}, {transform_indices = @transform_3, window_bounds = array<i64: 1, 4, 1, 128>}, {transform_indices = @transform_4, window_bounds = array<i64: 1, 4, 1, 128>}]} {
    %c0_i32 = arith.constant 0 : i32
    %0 = arith.cmpi eq, %arg1, %c0_i32 : i32
    %1 = arith.extui %0 : i1 to i32
    %c0_i32_0 = arith.constant 0 : i32
    %2 = arith.cmpi ne, %1, %c0_i32_0 : i32
    scf.if %2 {
      %cst_124 = arith.constant 0.000000e+00 : f32
      %129 = vector.broadcast %cst_124 : f32 to vector<4x1x128xf32>
      %c0_125 = arith.constant 0 : index
      %c0_126 = arith.constant 0 : index
      %c0_127 = arith.constant 0 : index
      %c0_128 = arith.constant 0 : index
      %130 = vector.load %arg4[%c0_125, %c0_126, %c0_127, %c0_128] : memref<1x4x1x128xf32, #tpu.memory_space<vmem>>, vector<1x4x1x128xf32>
      %131 = vector.shape_cast %130 : vector<1x4x1x128xf32> to vector<4x1x128xf32>
      %132 = vector.shape_cast %129 : vector<4x1x128xf32> to vector<1x4x1x128xf32>
      tpu.vector_store %arg4[%c0_125, %c0_126, %c0_127, %c0_128], %132 {strides = array<i32>} : memref<1x4x1x128xf32, #tpu.memory_space<vmem>>, vector<1x4x1x128xf32>,
      %cst_129 = arith.constant 0.000000e+00 : f32
      %133 = vector.broadcast %cst_129 : f32 to vector<4x1x128xf32>
      %c0_130 = arith.constant 0 : index
      %c0_131 = arith.constant 0 : index
      %c0_132 = arith.constant 0 : index
      %c0_133 = arith.constant 0 : index
      %134 = vector.load %arg5[%c0_130, %c0_131, %c0_132, %c0_133] : memref<1x4x1x128xf32, #tpu.memory_space<vmem>>, vector<1x4x1x128xf32>
      %135 = vector.shape_cast %134 : vector<1x4x1x128xf32> to vector<4x1x128xf32>
      %136 = vector.shape_cast %133 : vector<4x1x128xf32> to vector<1x4x1x128xf32>
      tpu.vector_store %arg5[%c0_130, %c0_131, %c0_132, %c0_133], %136 {strides = array<i32>} : memref<1x4x1x128xf32, #tpu.memory_space<vmem>>, vector<1x4x1x128xf32>,
      %cst_134 = arith.constant 0.000000e+00 : f32
      %137 = vector.broadcast %cst_134 : f32 to vector<4x1x128xf32>
      %c0_135 = arith.constant 0 : index
      %c0_136 = arith.constant 0 : index
      %c0_137 = arith.constant 0 : index
      %c0_138 = arith.constant 0 : index
      %138 = vector.load %arg6[%c0_135, %c0_136, %c0_137, %c0_138] : memref<1x4x1x128xf32, #tpu.memory_space<vmem>>, vector<1x4x1x128xf32>
      %139 = vector.shape_cast %138 : vector<1x4x1x128xf32> to vector<4x1x128xf32>
      %140 = vector.shape_cast %137 : vector<4x1x128xf32> to vector<1x4x1x128xf32>
      tpu.vector_store %arg6[%c0_135, %c0_136, %c0_137, %c0_138], %140 {strides = array<i32>} : memref<1x4x1x128xf32, #tpu.memory_space<vmem>>, vector<1x4x1x128xf32>,
    } else {
    }
    %c0 = arith.constant 0 : index
    %c0_1 = arith.constant 0 : index
    %c0_2 = arith.constant 0 : index
    %3 = vector.load %arg3[%c0, %c0_1, %c0_2] : memref<1x2x128xi32, #tpu.memory_space<vmem>>, vector<1x2x128xi32>
    %4 = vector.shape_cast %3 : vector<1x2x128xi32> to vector<2x128xi32>
    %c0_3 = arith.constant 0 : index
    %c0_4 = arith.constant 0 : index
    %c0_5 = arith.constant 0 : index
    %c0_6 = arith.constant 0 : index
    %5 = vector.load %arg2[%c0_3, %c0_4, %c0_5, %c0_6] : memref<1x4x2x128xf32, #tpu.memory_space<vmem>>, vector<1x1x2x128xf32>
    %6 = vector.shape_cast %5 : vector<1x1x2x128xf32> to vector<2x128xf32>
    %c0_i32_7 = arith.constant 0 : i32
    %7 = vector.broadcast %c0_i32_7 : i32 to vector<2x128xi32>
    %8 = arith.cmpi eq, %4, %7 : vector<2x128xi32>
    %9 = arith.extui %8 : vector<2x128xi1> to vector<2x128xi32>
    %10 = arith.sitofp %9 : vector<2x128xi32> to vector<2x128xf32>
    %c0_8 = arith.constant 0 : index
    %c0_9 = arith.constant 0 : index
    %c0_10 = arith.constant 0 : index
    %c0_11 = arith.constant 0 : index
    %11 = vector.load %arg4[%c0_8, %c0_9, %c0_10, %c0_11] : memref<1x4x1x128xf32, #tpu.memory_space<vmem>>, vector<1x1x1x128xf32>
    %12 = vector.shape_cast %11 : vector<1x1x1x128xf32> to vector<1x128xf32>
    %13 = arith.mulf %6, %10 : vector<2x128xf32>
    %cst = arith.constant dense<0.000000e+00> : vector<128xf32>
    %14 = vector.multi_reduction <add>, %13, %cst [0] : vector<2x128xf32> to vector<128xf32>
    %15 = vector.shape_cast %14 : vector<128xf32> to vector<1x128xf32>
    %16 = arith.addf %12, %15 : vector<1x128xf32>
    %c0_12 = arith.constant 0 : index
    %c0_13 = arith.constant 0 : index
    %c0_14 = arith.constant 0 : index
    %c0_15 = arith.constant 0 : index
    %17 = vector.load %arg4[%c0_12, %c0_13, %c0_14, %c0_15] : memref<1x4x1x128xf32, #tpu.memory_space<vmem>>, vector<1x1x1x128xf32>
    %18 = vector.shape_cast %17 : vector<1x1x1x128xf32> to vector<1x128xf32>
    %19 = vector.shape_cast %16 : vector<1x128xf32> to vector<1x1x1x128xf32>
    tpu.vector_store %arg4[%c0_12, %c0_13, %c0_14, %c0_15], %19 {strides = array<i32>} : memref<1x4x1x128xf32, #tpu.memory_space<vmem>>, vector<1x1x1x128xf32>,
    %c0_16 = arith.constant 0 : index
    %c0_17 = arith.constant 0 : index
    %c0_18 = arith.constant 0 : index
    %c0_19 = arith.constant 0 : index
    %20 = vector.load %arg5[%c0_16, %c0_17, %c0_18, %c0_19] : memref<1x4x1x128xf32, #tpu.memory_space<vmem>>, vector<1x1x1x128xf32>
    %21 = vector.shape_cast %20 : vector<1x1x1x128xf32> to vector<1x128xf32>
    %cst_20 = arith.constant dense<0.000000e+00> : vector<128xf32>
    %22 = vector.multi_reduction <add>, %6, %cst_20 [0] : vector<2x128xf32> to vector<128xf32>
    %23 = vector.shape_cast %22 : vector<128xf32> to vector<1x128xf32>
    %24 = arith.addf %21, %23 : vector<1x128xf32>
    %c0_21 = arith.constant 0 : index
    %c0_22 = arith.constant 0 : index
    %c0_23 = arith.constant 0 : index
    %c0_24 = arith.constant 0 : index
    %25 = vector.load %arg5[%c0_21, %c0_22, %c0_23, %c0_24] : memref<1x4x1x128xf32, #tpu.memory_space<vmem>>, vector<1x1x1x128xf32>
    %26 = vector.shape_cast %25 : vector<1x1x1x128xf32> to vector<1x128xf32>
    %27 = vector.shape_cast %24 : vector<1x128xf32> to vector<1x1x1x128xf32>
    tpu.vector_store %arg5[%c0_21, %c0_22, %c0_23, %c0_24], %27 {strides = array<i32>} : memref<1x4x1x128xf32, #tpu.memory_space<vmem>>, vector<1x1x1x128xf32>,
    %c0_25 = arith.constant 0 : index
    %c0_26 = arith.constant 0 : index
    %c0_27 = arith.constant 0 : index
    %c0_28 = arith.constant 0 : index
    %28 = vector.load %arg6[%c0_25, %c0_26, %c0_27, %c0_28] : memref<1x4x1x128xf32, #tpu.memory_space<vmem>>, vector<1x1x1x128xf32>
    %29 = vector.shape_cast %28 : vector<1x1x1x128xf32> to vector<1x128xf32>
    %cst_29 = arith.constant dense<0.000000e+00> : vector<128xf32>
    %30 = vector.multi_reduction <add>, %10, %cst_29 [0] : vector<2x128xf32> to vector<128xf32>
    %31 = vector.shape_cast %30 : vector<128xf32> to vector<1x128xf32>
    %32 = arith.addf %29, %31 : vector<1x128xf32>
    %c0_30 = arith.constant 0 : index
    %c0_31 = arith.constant 0 : index
    %c0_32 = arith.constant 0 : index
    %c0_33 = arith.constant 0 : index
    %33 = vector.load %arg6[%c0_30, %c0_31, %c0_32, %c0_33] : memref<1x4x1x128xf32, #tpu.memory_space<vmem>>, vector<1x1x1x128xf32>
    %34 = vector.shape_cast %33 : vector<1x1x1x128xf32> to vector<1x128xf32>
    %35 = vector.shape_cast %32 : vector<1x128xf32> to vector<1x1x1x128xf32>
    tpu.vector_store %arg6[%c0_30, %c0_31, %c0_32, %c0_33], %35 {strides = array<i32>} : memref<1x4x1x128xf32, #tpu.memory_space<vmem>>, vector<1x1x1x128xf32>,
    %c0_34 = arith.constant 0 : index
    %c1 = arith.constant 1 : index
    %c0_35 = arith.constant 0 : index
    %c0_36 = arith.constant 0 : index
    %36 = vector.load %arg2[%c0_34, %c1, %c0_35, %c0_36] : memref<1x4x2x128xf32, #tpu.memory_space<vmem>>, vector<1x1x2x128xf32>
    %37 = vector.shape_cast %36 : vector<1x1x2x128xf32> to vector<2x128xf32>
    %c1_i32 = arith.constant 1 : i32
    %38 = vector.broadcast %c1_i32 : i32 to vector<2x128xi32>
    %39 = arith.cmpi eq, %4, %38 : vector<2x128xi32>
    %40 = arith.extui %39 : vector<2x128xi1> to vector<2x128xi32>
    %41 = arith.sitofp %40 : vector<2x128xi32> to vector<2x128xf32>
    %c0_37 = arith.constant 0 : index
    %c1_38 = arith.constant 1 : index
    %c0_39 = arith.constant 0 : index
    %c0_40 = arith.constant 0 : index
    %42 = vector.load %arg4[%c0_37, %c1_38, %c0_39, %c0_40] : memref<1x4x1x128xf32, #tpu.memory_space<vmem>>, vector<1x1x1x128xf32>
    %43 = vector.shape_cast %42 : vector<1x1x1x128xf32> to vector<1x128xf32>
    %44 = arith.mulf %37, %41 : vector<2x128xf32>
    %cst_41 = arith.constant dense<0.000000e+00> : vector<128xf32>
    %45 = vector.multi_reduction <add>, %44, %cst_41 [0] : vector<2x128xf32> to vector<128xf32>
    %46 = vector.shape_cast %45 : vector<128xf32> to vector<1x128xf32>
    %47 = arith.addf %43, %46 : vector<1x128xf32>
    %c0_42 = arith.constant 0 : index
    %c1_43 = arith.constant 1 : index
    %c0_44 = arith.constant 0 : index
    %c0_45 = arith.constant 0 : index
    %48 = vector.load %arg4[%c0_42, %c1_43, %c0_44, %c0_45] : memref<1x4x1x128xf32, #tpu.memory_space<vmem>>, vector<1x1x1x128xf32>
    %49 = vector.shape_cast %48 : vector<1x1x1x128xf32> to vector<1x128xf32>
    %50 = vector.shape_cast %47 : vector<1x128xf32> to vector<1x1x1x128xf32>
    tpu.vector_store %arg4[%c0_42, %c1_43, %c0_44, %c0_45], %50 {strides = array<i32>} : memref<1x4x1x128xf32, #tpu.memory_space<vmem>>, vector<1x1x1x128xf32>,
    %c0_46 = arith.constant 0 : index
    %c1_47 = arith.constant 1 : index
    %c0_48 = arith.constant 0 : index
    %c0_49 = arith.constant 0 : index
    %51 = vector.load %arg5[%c0_46, %c1_47, %c0_48, %c0_49] : memref<1x4x1x128xf32, #tpu.memory_space<vmem>>, vector<1x1x1x128xf32>
    %52 = vector.shape_cast %51 : vector<1x1x1x128xf32> to vector<1x128xf32>
    %cst_50 = arith.constant dense<0.000000e+00> : vector<128xf32>
    %53 = vector.multi_reduction <add>, %37, %cst_50 [0] : vector<2x128xf32> to vector<128xf32>
    %54 = vector.shape_cast %53 : vector<128xf32> to vector<1x128xf32>
    %55 = arith.addf %52, %54 : vector<1x128xf32>
    %c0_51 = arith.constant 0 : index
    %c1_52 = arith.constant 1 : index
    %c0_53 = arith.constant 0 : index
    %c0_54 = arith.constant 0 : index
    %56 = vector.load %arg5[%c0_51, %c1_52, %c0_53, %c0_54] : memref<1x4x1x128xf32, #tpu.memory_space<vmem>>, vector<1x1x1x128xf32>
    %57 = vector.shape_cast %56 : vector<1x1x1x128xf32> to vector<1x128xf32>
    %58 = vector.shape_cast %55 : vector<1x128xf32> to vector<1x1x1x128xf32>
    tpu.vector_store %arg5[%c0_51, %c1_52, %c0_53, %c0_54], %58 {strides = array<i32>} : memref<1x4x1x128xf32, #tpu.memory_space<vmem>>, vector<1x1x1x128xf32>,
    %c0_55 = arith.constant 0 : index
    %c1_56 = arith.constant 1 : index
    %c0_57 = arith.constant 0 : index
    %c0_58 = arith.constant 0 : index
    %59 = vector.load %arg6[%c0_55, %c1_56, %c0_57, %c0_58] : memref<1x4x1x128xf32, #tpu.memory_space<vmem>>, vector<1x1x1x128xf32>
    %60 = vector.shape_cast %59 : vector<1x1x1x128xf32> to vector<1x128xf32>
    %cst_59 = arith.constant dense<0.000000e+00> : vector<128xf32>
    %61 = vector.multi_reduction <add>, %41, %cst_59 [0] : vector<2x128xf32> to vector<128xf32>
    %62 = vector.shape_cast %61 : vector<128xf32> to vector<1x128xf32>
    %63 = arith.addf %60, %62 : vector<1x128xf32>
    %c0_60 = arith.constant 0 : index
    %c1_61 = arith.constant 1 : index
    %c0_62 = arith.constant 0 : index
    %c0_63 = arith.constant 0 : index
    %64 = vector.load %arg6[%c0_60, %c1_61, %c0_62, %c0_63] : memref<1x4x1x128xf32, #tpu.memory_space<vmem>>, vector<1x1x1x128xf32>
    %65 = vector.shape_cast %64 : vector<1x1x1x128xf32> to vector<1x128xf32>
    %66 = vector.shape_cast %63 : vector<1x128xf32> to vector<1x1x1x128xf32>
    tpu.vector_store %arg6[%c0_60, %c1_61, %c0_62, %c0_63], %66 {strides = array<i32>} : memref<1x4x1x128xf32, #tpu.memory_space<vmem>>, vector<1x1x1x128xf32>,
    %c0_64 = arith.constant 0 : index
    %c2 = arith.constant 2 : index
    %c0_65 = arith.constant 0 : index
    %c0_66 = arith.constant 0 : index
    %67 = vector.load %arg2[%c0_64, %c2, %c0_65, %c0_66] : memref<1x4x2x128xf32, #tpu.memory_space<vmem>>, vector<1x1x2x128xf32>
    %68 = vector.shape_cast %67 : vector<1x1x2x128xf32> to vector<2x128xf32>
    %c2_i32 = arith.constant 2 : i32
    %69 = vector.broadcast %c2_i32 : i32 to vector<2x128xi32>
    %70 = arith.cmpi eq, %4, %69 : vector<2x128xi32>
    %71 = arith.extui %70 : vector<2x128xi1> to vector<2x128xi32>
    %72 = arith.sitofp %71 : vector<2x128xi32> to vector<2x128xf32>
    %c0_67 = arith.constant 0 : index
    %c2_68 = arith.constant 2 : index
    %c0_69 = arith.constant 0 : index
    %c0_70 = arith.constant 0 : index
    %73 = vector.load %arg4[%c0_67, %c2_68, %c0_69, %c0_70] : memref<1x4x1x128xf32, #tpu.memory_space<vmem>>, vector<1x1x1x128xf32>
    %74 = vector.shape_cast %73 : vector<1x1x1x128xf32> to vector<1x128xf32>
    %75 = arith.mulf %68, %72 : vector<2x128xf32>
    %cst_71 = arith.constant dense<0.000000e+00> : vector<128xf32>
    %76 = vector.multi_reduction <add>, %75, %cst_71 [0] : vector<2x128xf32> to vector<128xf32>
    %77 = vector.shape_cast %76 : vector<128xf32> to vector<1x128xf32>
    %78 = arith.addf %74, %77 : vector<1x128xf32>
    %c0_72 = arith.constant 0 : index
    %c2_73 = arith.constant 2 : index
    %c0_74 = arith.constant 0 : index
    %c0_75 = arith.constant 0 : index
    %79 = vector.load %arg4[%c0_72, %c2_73, %c0_74, %c0_75] : memref<1x4x1x128xf32, #tpu.memory_space<vmem>>, vector<1x1x1x128xf32>
    %80 = vector.shape_cast %79 : vector<1x1x1x128xf32> to vector<1x128xf32>
    %81 = vector.shape_cast %78 : vector<1x128xf32> to vector<1x1x1x128xf32>
    tpu.vector_store %arg4[%c0_72, %c2_73, %c0_74, %c0_75], %81 {strides = array<i32>} : memref<1x4x1x128xf32, #tpu.memory_space<vmem>>, vector<1x1x1x128xf32>,
    %c0_76 = arith.constant 0 : index
    %c2_77 = arith.constant 2 : index
    %c0_78 = arith.constant 0 : index
    %c0_79 = arith.constant 0 : index
    %82 = vector.load %arg5[%c0_76, %c2_77, %c0_78, %c0_79] : memref<1x4x1x128xf32, #tpu.memory_space<vmem>>, vector<1x1x1x128xf32>
    %83 = vector.shape_cast %82 : vector<1x1x1x128xf32> to vector<1x128xf32>
    %cst_80 = arith.constant dense<0.000000e+00> : vector<128xf32>
    %84 = vector.multi_reduction <add>, %68, %cst_80 [0] : vector<2x128xf32> to vector<128xf32>
    %85 = vector.shape_cast %84 : vector<128xf32> to vector<1x128xf32>
    %86 = arith.addf %83, %85 : vector<1x128xf32>
    %c0_81 = arith.constant 0 : index
    %c2_82 = arith.constant 2 : index
    %c0_83 = arith.constant 0 : index
    %c0_84 = arith.constant 0 : index
    %87 = vector.load %arg5[%c0_81, %c2_82, %c0_83, %c0_84] : memref<1x4x1x128xf32, #tpu.memory_space<vmem>>, vector<1x1x1x128xf32>
    %88 = vector.shape_cast %87 : vector<1x1x1x128xf32> to vector<1x128xf32>
    %89 = vector.shape_cast %86 : vector<1x128xf32> to vector<1x1x1x128xf32>
    tpu.vector_store %arg5[%c0_81, %c2_82, %c0_83, %c0_84], %89 {strides = array<i32>} : memref<1x4x1x128xf32, #tpu.memory_space<vmem>>, vector<1x1x1x128xf32>,
    %c0_85 = arith.constant 0 : index
    %c2_86 = arith.constant 2 : index
    %c0_87 = arith.constant 0 : index
    %c0_88 = arith.constant 0 : index
    %90 = vector.load %arg6[%c0_85, %c2_86, %c0_87, %c0_88] : memref<1x4x1x128xf32, #tpu.memory_space<vmem>>, vector<1x1x1x128xf32>
    %91 = vector.shape_cast %90 : vector<1x1x1x128xf32> to vector<1x128xf32>
    %cst_89 = arith.constant dense<0.000000e+00> : vector<128xf32>
    %92 = vector.multi_reduction <add>, %72, %cst_89 [0] : vector<2x128xf32> to vector<128xf32>
    %93 = vector.shape_cast %92 : vector<128xf32> to vector<1x128xf32>
    %94 = arith.addf %91, %93 : vector<1x128xf32>
    %c0_90 = arith.constant 0 : index
    %c2_91 = arith.constant 2 : index
    %c0_92 = arith.constant 0 : index
    %c0_93 = arith.constant 0 : index
    %95 = vector.load %arg6[%c0_90, %c2_91, %c0_92, %c0_93] : memref<1x4x1x128xf32, #tpu.memory_space<vmem>>, vector<1x1x1x128xf32>
    %96 = vector.shape_cast %95 : vector<1x1x1x128xf32> to vector<1x128xf32>
    %97 = vector.shape_cast %94 : vector<1x128xf32> to vector<1x1x1x128xf32>
    tpu.vector_store %arg6[%c0_90, %c2_91, %c0_92, %c0_93], %97 {strides = array<i32>} : memref<1x4x1x128xf32, #tpu.memory_space<vmem>>, vector<1x1x1x128xf32>,
    %c0_94 = arith.constant 0 : index
    %c3 = arith.constant 3 : index
    %c0_95 = arith.constant 0 : index
    %c0_96 = arith.constant 0 : index
    %98 = vector.load %arg2[%c0_94, %c3, %c0_95, %c0_96] : memref<1x4x2x128xf32, #tpu.memory_space<vmem>>, vector<1x1x2x128xf32>
    %99 = vector.shape_cast %98 : vector<1x1x2x128xf32> to vector<2x128xf32>
    %c3_i32 = arith.constant 3 : i32
    %100 = vector.broadcast %c3_i32 : i32 to vector<2x128xi32>
    %101 = arith.cmpi eq, %4, %100 : vector<2x128xi32>
    %102 = arith.extui %101 : vector<2x128xi1> to vector<2x128xi32>
    %103 = arith.sitofp %102 : vector<2x128xi32> to vector<2x128xf32>
    %c0_97 = arith.constant 0 : index
    %c3_98 = arith.constant 3 : index
    %c0_99 = arith.constant 0 : index
    %c0_100 = arith.constant 0 : index
    %104 = vector.load %arg4[%c0_97, %c3_98, %c0_99, %c0_100] : memref<1x4x1x128xf32, #tpu.memory_space<vmem>>, vector<1x1x1x128xf32>
    %105 = vector.shape_cast %104 : vector<1x1x1x128xf32> to vector<1x128xf32>
    %106 = arith.mulf %99, %103 : vector<2x128xf32>
    %cst_101 = arith.constant dense<0.000000e+00> : vector<128xf32>
    %107 = vector.multi_reduction <add>, %106, %cst_101 [0] : vector<2x128xf32> to vector<128xf32>
    %108 = vector.shape_cast %107 : vector<128xf32> to vector<1x128xf32>
    %109 = arith.addf %105, %108 : vector<1x128xf32>
    %c0_102 = arith.constant 0 : index
    %c3_103 = arith.constant 3 : index
    %c0_104 = arith.constant 0 : index
    %c0_105 = arith.constant 0 : index
    %110 = vector.load %arg4[%c0_102, %c3_103, %c0_104, %c0_105] : memref<1x4x1x128xf32, #tpu.memory_space<vmem>>, vector<1x1x1x128xf32>
    %111 = vector.shape_cast %110 : vector<1x1x1x128xf32> to vector<1x128xf32>
    %112 = vector.shape_cast %109 : vector<1x128xf32> to vector<1x1x1x128xf32>
    tpu.vector_store %arg4[%c0_102, %c3_103, %c0_104, %c0_105], %112 {strides = array<i32>} : memref<1x4x1x128xf32, #tpu.memory_space<vmem>>, vector<1x1x1x128xf32>,
    %c0_106 = arith.constant 0 : index
    %c3_107 = arith.constant 3 : index
    %c0_108 = arith.constant 0 : index
    %c0_109 = arith.constant 0 : index
    %113 = vector.load %arg5[%c0_106, %c3_107, %c0_108, %c0_109] : memref<1x4x1x128xf32, #tpu.memory_space<vmem>>, vector<1x1x1x128xf32>
    %114 = vector.shape_cast %113 : vector<1x1x1x128xf32> to vector<1x128xf32>
    %cst_110 = arith.constant dense<0.000000e+00> : vector<128xf32>
    %115 = vector.multi_reduction <add>, %99, %cst_110 [0] : vector<2x128xf32> to vector<128xf32>
    %116 = vector.shape_cast %115 : vector<128xf32> to vector<1x128xf32>
    %117 = arith.addf %114, %116 : vector<1x128xf32>
    %c0_111 = arith.constant 0 : index
    %c3_112 = arith.constant 3 : index
    %c0_113 = arith.constant 0 : index
    %c0_114 = arith.constant 0 : index
    %118 = vector.load %arg5[%c0_111, %c3_112, %c0_113, %c0_114] : memref<1x4x1x128xf32, #tpu.memory_space<vmem>>, vector<1x1x1x128xf32>
    %119 = vector.shape_cast %118 : vector<1x1x1x128xf32> to vector<1x128xf32>
    %120 = vector.shape_cast %117 : vector<1x128xf32> to vector<1x1x1x128xf32>
    tpu.vector_store %arg5[%c0_111, %c3_112, %c0_113, %c0_114], %120 {strides = array<i32>} : memref<1x4x1x128xf32, #tpu.memory_space<vmem>>, vector<1x1x1x128xf32>,
    %c0_115 = arith.constant 0 : index
    %c3_116 = arith.constant 3 : index
    %c0_117 = arith.constant 0 : index
    %c0_118 = arith.constant 0 : index
    %121 = vector.load %arg6[%c0_115, %c3_116, %c0_117, %c0_118] : memref<1x4x1x128xf32, #tpu.memory_space<vmem>>, vector<1x1x1x128xf32>
    %122 = vector.shape_cast %121 : vector<1x1x1x128xf32> to vector<1x128xf32>
    %cst_119 = arith.constant dense<0.000000e+00> : vector<128xf32>
    %123 = vector.multi_reduction <add>, %103, %cst_119 [0] : vector<2x128xf32> to vector<128xf32>
    %124 = vector.shape_cast %123 : vector<128xf32> to vector<1x128xf32>
    %125 = arith.addf %122, %124 : vector<1x128xf32>
    %c0_120 = arith.constant 0 : index
    %c3_121 = arith.constant 3 : index
    %c0_122 = arith.constant 0 : index
    %c0_123 = arith.constant 0 : index
    %126 = vector.load %arg6[%c0_120, %c3_121, %c0_122, %c0_123] : memref<1x4x1x128xf32, #tpu.memory_space<vmem>>, vector<1x1x1x128xf32>
    %127 = vector.shape_cast %126 : vector<1x1x1x128xf32> to vector<1x128xf32>
    %128 = vector.shape_cast %125 : vector<1x128xf32> to vector<1x1x1x128xf32>
    tpu.vector_store %arg6[%c0_120, %c3_121, %c0_122, %c0_123], %128 {strides = array<i32>} : memref<1x4x1x128xf32, #tpu.memory_space<vmem>>, vector<1x1x1x128xf32>,
    return
  }
  func.func @transform_0(%arg0: i32, %arg1: i32) -> (i32, i32, i32, i32) {
    %c0_i32 = arith.constant 0 : i32
    %c0_i32_0 = arith.constant 0 : i32
    %c0_i32_1 = arith.constant 0 : i32
    return %arg0, %c0_i32, %arg1, %c0_i32_0 : i32, i32, i32, i32
  }
  func.func @transform_1(%arg0: i32, %arg1: i32) -> (i32, i32, i32) {
    %c0_i32 = arith.constant 0 : i32
    %c0_i32_0 = arith.constant 0 : i32
    return %arg0, %arg1, %c0_i32 : i32, i32, i32
  }
  func.func @transform_2(%arg0: i32, %arg1: i32) -> (i32, i32, i32, i32) {
    %c0_i32 = arith.constant 0 : i32
    %c0_i32_0 = arith.constant 0 : i32
    %c0_i32_1 = arith.constant 0 : i32
    %c0_i32_2 = arith.constant 0 : i32
    return %arg0, %c0_i32, %c0_i32_0, %c0_i32_1 : i32, i32, i32, i32
  }
  func.func @transform_3(%arg0: i32, %arg1: i32) -> (i32, i32, i32, i32) {
    %c0_i32 = arith.constant 0 : i32
    %c0_i32_0 = arith.constant 0 : i32
    %c0_i32_1 = arith.constant 0 : i32
    %c0_i32_2 = arith.constant 0 : i32
    return %arg0, %c0_i32, %c0_i32_0, %c0_i32_1 : i32, i32, i32, i32
  }
  func.func @transform_4(%arg0: i32, %arg1: i32) -> (i32, i32, i32, i32) {
    %c0_i32 = arith.constant 0 : i32
    %c0_i32_0 = arith.constant 0 : i32
    %c0_i32_1 = arith.constant 0 : i32
    %c0_i32_2 = arith.constant 0 : i32
    return %arg0, %c0_i32, %c0_i32_0, %c0_i32_1 : i32, i32, i32, i32
  }
}

</mosaic_0001>

<bundles_post_ra>
// kernel: tpu_custom_call.1
= control target key start
LH: loop header
LB: loop body
LE: loop exit
PB: predicated region body
PF: predicated region fallthrough
CT: control target
= control target key end

     0   :  { %s1366_s0 = inlined_call_operand.hbm [shape: f32[2,4,2,128], index: 0, kind: input, shape index: {}]   ;;  %s1367_s1 = inlined_call_operand.hbm [shape: s32[2,2,128], index: 1, kind: input, shape index: {}]   ;;  %s1368_s2 = inlined_call_operand.hbm [shape: f32[2,4,1,128], index: 2, kind: output, shape index: {0}]   ;;  %s1369_s3 = inlined_call_operand.hbm [shape: f32[2,4,1,128], index: 3, kind: output, shape index: {1}]   ;;  %s1370_s4 = inlined_call_operand.hbm [shape: f32[2,4,1,128], index: 4, kind: output, shape index: {2}]  }
   0x1   :  { %1373 = sst [smem:[#allocation16_spill]] %s1366_s0 }
   0x2   :  { %10 = vsyncpa [#allocation3], 0 }
   0x3   :  { %12 = vsyncpa [#allocation3 + $0x1], 0 }
   0x4   :  { %13 = vsyncpa [#allocation6], 0 }
   0x5   :  { %15 = vsyncpa [#allocation6 + $0x1], 0 }
   0x6   :  { %16 = vsyncpa [#allocation4], 0 }
   0x7   :  { %18 = vsyncpa [#allocation4 + $0x1], 0 }
   0x8   :  { %19 = vsyncpa [#allocation9], 0 }
   0x9   :  { %21 = vsyncpa [#allocation9 + $0x1], 0  ;;  %s1059_s15 = smov 0   ;;  %s1061_s16 = smov 0  }
   0xa   :  { %s1063_s17 = smov 0   ;;  %s1065_s18 = smov 0  }
   0xb   :  { %s1067_s19 = smov 0   ;;  %s1069_s20 = smov 0  }
   0xc LB: > { %s1090_s21 = sadd.s32 4294967295, %s1027_s20   ;;  %s1371_s22 = sadd.s32 4294967294, %s1027_s20   ;;  %s1027_s20 = sphi %s1069_s20, %s27_s20   ;;  %s1023_s19 = sphi %s1067_s19, %s1387_s19   ;;  %s1019_s18 = sphi %s1065_s18, %s1386_s18   ;;  %s1015_s17 = sphi %s1063_s17, %s1385_s17   ;;  %s1011_s16 = sphi %s1061_s16, %s1384_s16   ;;  %s1007_s15 = sphi %s1059_s15, %s1383_s15  }
   0xd   : > { %s39_s23 = sadd.s32 1, %s1023_s19  ;;  %s48_s24 = sadd.s32 1, %s1015_s17 }
   0xe   : > { %p41_p0 = scmp.ge.s32.totalorder %s39_s23, 2  ;;  %p55_p1 = scmp.ne.s32.totalorder %s1015_s17, %s1011_s16 }
   0xf   : > { %p56_p2 = scmp.eq.s32.totalorder %s1027_s20, 0  ;;  %p61_p3 = scmp.ne.s32.totalorder %s1011_s16, %s1007_s15 }
  0x10   : > { %s1389_s23 = smov (%p41_p0, %s39_s23), 0  ;;  %p62_p5 = scmp.eq.s32.totalorder %s1090_s21, 0 }
  0x11   : > { %1374 = sst [smem:[#allocation15_spill]] %s1389_s23  ;;  %p1102_p4 = por %p56_p2, %p55_p1 }
  0x12   : > { %s43_s26 = ssub.s32 %s1023_s19, %s1389_s23  ;;  %p113_p6 = scmp.eq.s32.totalorder %s1090_s21, 1 }
  0x13   : > { %p46_p7 = scmp.eq.s32.totalorder %s43_s26, 0  ;;  %p1110_p8 = por %p62_p5, %p61_p3 }
  0x14   : > { %p1114_p9 = por %p113_p6, %p55_p1  ;;  %p119_p10 = scmp.eq.s32.totalorder %s1371_s22, 1 }
  0x15   : > { %s1121_s29 = scalar_select %p46_p7, %s1015_s17, %s48_s24  }
  0x16   : > { %p1123_p11 = por %p119_p10, %p61_p3  ;;  %p693_p12 = scmp.ge.s32.totalorder %s1027_s20, 2 }
  0x17   : > { %p766_p13 = scmp.lt.s32.totalorder %s1027_s20, 2  ;;  %s191_s5 = sand.u32 1, %s1015_s17  }
  0x18   : > { %s694_s6 = sshll.u32 %s191_s5, 3  ;;  %s738_s7 = sshll.u32 %s1023_s19, 3 }
  0x19   : > { %s1379_s0 = sld [smem:[#allocation16_spill]]  ;;  %s195_s11 = scalar_lea.vmem [#allocation2], %s694_s6 }
  0x1a   : > { %s204_s12 = sshll.u32 %s195_s11, 4  ;;  %p1136_p0 = pnand %p766_p13, %p1102_p4  ;;  %s205_s12 = int_to_ptr.vmem [resolvable:$true] %s204_s12 }
  0x1b   : > { %p699_p1 = scmp.ge.s32.totalorder %s1027_s20, 1  ;;  %s192_s24 = scalar_lea.sflag [#allocation3], %s191_s5 }
  0x1c   : > { %s1029_s26 = smov 32   ;;  %s1030_s22 = smov 2  }
  0x1d   : > { %p232_p2 = scmp.lt.s32.totalorder %s1027_s20, 3  ;;  %s698_s6 = sshll.u32 %s1023_s19, 1 }
  0x1e   : > { %s223_s25 = scalar_lea.hbm %s1367_s1, %s698_s6  ;;  %s215_s23 = scalar_lea.sflag [#allocation6], %s191_s5 }
  0x1f   : > { %s201_s10 = scalar_lea.hbm %s1379_s0, %s738_s7  ;;  %s697_s7 = sshll.u32 %s191_s5, 1 }
  0x20   : > { %s202_s13 = sshll.u32 %s201_s10, 4  ;;  %p233_p3 = pnand %p699_p1, %p232_p2  ;;  %s203_s13 = int_to_ptr.hbm [resolvable:$true] %s202_s13 }
  0x21   : > { %752 = dma.hbm_to_vmem [thread:$0]  (!%p1136_p0), %s203_s13, 128, %s205_s12, %s192_s24, %s1029_s26, %s1029_s26, %s1030_s22  }
  0x22   : > { %s218_s10 = scalar_lea.vmem [#allocation5], %s697_s7  ;;  %s225_s0 = sshll.u32 %s223_s25, 4  ;;  %s226_s0 = int_to_ptr.hbm [resolvable:$true] %s225_s0 }
  0x23   : > { %s227_s11 = sshll.u32 %s218_s10, 4  ;;  %236 = sbr.rel (%p233_p3) target bundleno = 100 (0x64), region = 28  ;;  %s228_s11 = int_to_ptr.vmem [resolvable:$true] %s227_s11 }
  0x24   : > { %755 = dma.hbm_to_vmem [thread:$0]  (!%p1136_p0), %s226_s0, 32, %s228_s11, %s215_s23  }
  0x25   : > { %s1151_s22 = sand.u32 (!%p233_p3), 1, %s1011_s16  }
  0x26   : > { %s700_s12 = sshll.u32 (!%p233_p3), %s1151_s22, 3  ;;  %s239_s13 = scalar_lea.sflag (!%p233_p3), [#allocation3], %s1151_s22 }
  0x27   : > { %s1155_s24 = scalar_lea.vmem (!%p233_p3), [#allocation2], %s700_s12 }
  0x28   : > { %990 = dma.done.wait (%p1110_p8), %s239_s13, 128  }
  0x29   : > { %992 = vsyncadd (%p1110_p8), %s239_s13, 4294967168  ;;  %s701_s0 = sshll.u32 %s1151_s22, 1  ;;  %s249_s23 = scalar_lea.sflag [#allocation6], %s1151_s22 }
  0x2a   : > { %s1163_s5 = scalar_lea.vmem [#allocation5], %s701_s0 }
  0x2b   : > { %994 = dma.done.wait (%p1110_p8), %s249_s23, 32  }
  0x2c   : > { %996 = vsyncadd (%p1110_p8), %s249_s23, 4294967264  ;;  %s702_s14 = sshll.u32 %s1151_s22, 2  ;;  %v1031_v0 = vmov 0.0   ;;  %vm316_vm0 = vcmask 1041408   ;;  %v310_v1 = vld [vmem:[%s1155_s24] sm:$0x3] }
  0x2d   : > { %s1170_s26 = scalar_lea.vmem [#allocation8], %s702_s14  ;;  %s1180_s27 = scalar_lea.vmem [#allocation7], %s702_s14  ;;  %v706_v2 = vld [vmem:[%s1155_s24 + $0x2] sm:$0x3]  ;;  %v327_v3 = vsel %vm316_vm0, %v310_v1, 0.0 }
  0x2e   : > { %301 = vst [vmem:[%s1170_s26] sm:$0x1] %v1031_v0  ;;  %v365_v4 = vsel %vm316_vm0, %v706_v2, 0.0  ;;  %v1193_v5 = vld [vmem:[%s1155_s24 + $0x4] sm:$0x3]  ;;  %v328_v6 = vrot.slane %v327_v3, 4  ;;  %s1197_s7 = scalar_lea.vmem [#allocation10], %s702_s14 }
  0x2f   : > { %302 = vst [vmem:[%s1170_s26 + $0x1] sm:$0x1] %v1031_v0  ;;  %v366_v7 = vrot.slane %v365_v4, 4  ;;  %v404_v8 = vsel %vm316_vm0, %v1193_v5, 0.0  ;;  %v1204_v9 = vld [vmem:[%s1155_s24 + $0x6] sm:$0x3] }
  0x30   : > { %303 = vst [vmem:[%s1170_s26 + $0x2] sm:$0x1] %v1031_v0  ;;  %v329_v10 = vadd.f32 %v328_v6, %v327_v3  ;;  %v405_v12 = vrot.slane %v404_v8, 4  ;;  %v443_v13 = vsel %vm316_vm0, %v1204_v9, 0.0  ;;  %v309_v18 = vld [vmem:[%s1163_s5] sm:$0x3] }
  0x31   : > { %304 = vst [vmem:[%s1170_s26 + $0x3] sm:$0x1] %v1031_v0  ;;  %v367_v11 = vadd.f32 %v366_v7, %v365_v4  ;;  %v444_v14 = vrot.slane %v443_v13, 4  ;;  %vm311_vm1 = vcmp.eq.s32.totalorder %v309_v18, 0  ;;  %vm348_vm2 = vcmp.eq.s32.totalorder %v309_v18, 1  ;;  %s1217_s6 = sshll.u32 %s1019_s18, 2 }
  0x32   : > { %297 = vst [vmem:[%s1180_s27] sm:$0x1] %v1031_v0  ;;  %v330_v15 = vrot.slane %v329_v10, 2  ;;  %v406_v17 = vadd.f32 %v405_v12, %v404_v8  ;;  %v705_v23 = vsel %vm311_vm1, 1.0, %v1031_v0  ;;  %v707_v27 = vsel %vm348_vm2, 1.0, %v1031_v0  ;;  %s500_s9 = scalar_lea.hbm %s1369_s3, %s1217_s6  ;;  %s468_s25 = sand.u32 1, %s1090_s21  }
  0x33   : > { %298 = vst [vmem:[%s1180_s27 + $0x1] sm:$0x1] %v1031_v0  ;;  %v368_v16 = vrot.slane %v367_v11, 2  ;;  %v445_v19 = vadd.f32 %v444_v14, %v443_v13  ;;  %v315_v25 = vmul.f32 %v705_v23, %v310_v1  ;;  %v337_v26 = vsel %vm316_vm0, %v705_v23, 0.0  ;;  %s501_s10 = sshll.u32 %s1170_s26, 4  ;;  %s1234_s11 = sshll.u32 %s500_s9, 4  ;;  %s1238_s10 = int_to_ptr.vmem [resolvable:$true] %s501_s10  ;;  %s504_s11 = int_to_ptr.hbm [resolvable:$true] %s1234_s11 }
  0x34   : > { %299 = vst [vmem:[%s1180_s27 + $0x2] sm:$0x1] %v1031_v0  ;;  %v331_v20 = vadd.f32 %v330_v15, %v329_v10  ;;  %v407_v22 = vrot.slane %v406_v17, 2  ;;  %v338_v31 = vrot.slane %v337_v26, 4  ;;  %v353_v36 = vmul.f32 %v707_v27, %v706_v2  ;;  %s1252_s12 = scalar_lea.sflag [#allocation9], %s468_s25  ;;  %s895_s13 = sshra.s32 %s504_s11, 4  ;;  %s896_s13 = int_to_ptr.hbm [resolvable:$true] %s895_s13 }
  0x35   : > { %300 = vst [vmem:[%s1180_s27 + $0x3] sm:$0x1] %v1031_v0  ;;  %v369_v21 = vadd.f32 %v368_v16, %v367_v11  ;;  %v446_v24 = vrot.slane %v445_v19, 2  ;;  %v326_v32 = vld [vmem:[%s1170_s26] sm:$0x1]  ;;  %v317_v35 = vsel %vm316_vm0, %v315_v25, 0.0  ;;  %p902_p7 = scmp.lt.s32.totalorder %s896_s13, %s1369_s3 }
  0x36   : > { %305 = vst [vmem:[%s1197_s7] sm:$0x1] %v1031_v0  ;;  %v332_v28 = vrot.slane %v331_v20, 1  ;;  %v408_v30 = vadd.f32 %v407_v22, %v406_v17  ;;  %v710_v33 = vld [vmem:[%s1170_s26 + $0x1] sm:$0x1]  ;;  %v376_v37 = vsel %vm316_vm0, %v707_v27, 0.0  ;;  %v318_v41 = vrot.slane %v317_v35, 4 }
  0x37   : > { %306 = vst [vmem:[%s1197_s7 + $0x1] sm:$0x1] %v1031_v0  ;;  %v370_v29 = vrot.slane %v369_v21, 1  ;;  %v447_v34 = vadd.f32 %v446_v24, %v445_v19  ;;  %v718_v42 = vld [vmem:[%s1170_s26 + $0x2] sm:$0x1]  ;;  %v339_v44 = vadd.f32 %v338_v31, %v337_v26  ;;  %v354_v45 = vsel %vm316_vm0, %v353_v36, 0.0 }
  0x38   : > { %307 = vst [vmem:[%s1197_s7 + $0x2] sm:$0x1] %v1031_v0  ;;  %v333_v38 = vadd.f32 %v332_v28, %v331_v20  ;;  %v409_v40 = vrot.slane %v408_v30, 1  ;;  %v377_v46 = vrot.slane %v376_v37, 4  ;;  %v726_v50 = vld [vmem:[%s1170_s26 + $0x3] sm:$0x1]  ;;  %v319_v51 = vadd.f32 %v318_v41, %v317_v35 }
  0x39   : > { %308 = vst [vmem:[%s1197_s7 + $0x3] sm:$0x1] %v1031_v0  ;;  %v371_v39 = vadd.f32 %v370_v29, %v369_v21  ;;  %v448_v43 = vrot.slane %v447_v34, 1  ;;  %v340_v53 = vrot.slane %v339_v44, 2  ;;  %v355_v54 = vrot.slane %v354_v45, 4  ;;  %s897_s24 = scalar_lea.hbm %s896_s13, 4 }
  0x3a   : > { %v334_v47 = vadd.f32 %v333_v38, %v326_v32  ;;  %v410_v49 = vadd.f32 %v409_v40, %v408_v30  ;;  %v378_v55 = vadd.f32 %v377_v46, %v376_v37  ;;  %v320_v57 = vrot.slane %v319_v51, 2  ;;  %p898_p4 = scmp.ne.s32.totalorder %s896_s13, %s897_s24  ;;  %s901_s5 = scalar_lea.hbm %s1369_s3, 8 }
  0x3b   : > { %v372_v48 = vadd.f32 %v710_v33, %v371_v39  ;;  %v449_v52 = vadd.f32 %v448_v43, %v447_v34  ;;  %vm387_vm3 = vcmp.eq.s32.totalorder %v309_v18, 2  ;;  %vm426_vm4 = vcmp.eq.s32.totalorder %v309_v18, 3  ;;  %p903_p8 = scmp.lt.s32.totalorder %s901_s5, %s897_s24 }
  0x3c   : > { %335 = vst [vmem:[%s1170_s26] sm:$0x1] %v334_v47  ;;  %v411_v56 = vadd.f32 %v718_v42, %v410_v49  ;;  %v341_v59 = vadd.f32 %v340_v53, %v339_v44  ;;  %v356_v60 = vadd.f32 %v355_v54, %v354_v45  ;;  %v379_v61 = vrot.slane %v378_v55, 2  ;;  %p899_p5 = pnand %p898_p4, %p1114_p9 }
  0x3d   : > { %711 = vst [vmem:[%s1170_s26 + $0x1] sm:$0x1] %v372_v48  ;;  %v450_v58 = vadd.f32 %v726_v50, %v449_v52  ;;  %v321_v62 = vadd.f32 %v320_v57, %v319_v51  ;;  %v715_v63 = vsel %vm387_vm3, 1.0, %v1031_v0  ;;  %v723_v1 = vsel %vm426_vm4, 1.0, %v1031_v0  ;;  %v336_v2 = vld [vmem:[%s1197_s7] sm:$0x1]  ;;  %p904_p10 = por %p903_p8, %p902_p7 }
  0x3e   : > { %719 = vst [vmem:[%s1170_s26 + $0x2] sm:$0x1] %v411_v56  ;;  %v342_v3 = vrot.slane %v341_v59, 1  ;;  %v357_v4 = vrot.slane %v356_v60, 2  ;;  %v380_v6 = vadd.f32 %v379_v61, %v378_v55  ;;  %v392_v7 = vmul.f32 %v715_v63, %v1193_v5  ;;  %p900_p6 = pneg %p899_p5 }
  0x3f   : > { %727 = vst [vmem:[%s1170_s26 + $0x3] sm:$0x1] %v450_v58  ;;  %v322_v8 = vrot.slane %v321_v62, 1  ;;  %v415_v10 = vsel %vm316_vm0, %v715_v63, 0.0  ;;  %v431_v11 = vmul.f32 %v723_v1, %v1204_v9  ;;  %v454_v12 = vsel %vm316_vm0, %v723_v1, 0.0 }
  0x40   : > { %p905_p13 = pnand %p904_p10, %p900_p6 }
  0x42   : > { %908 = shalt.err (!%p905_p13)
}
  0x43   : > { %s1032_s21 = smov 16   ;;  %s1033_s18 = smov 1   ;;  %v314_v0 = vld [vmem:[%s1180_s27] sm:$0x1]  ;;  %v343_v5 = vadd.f32 %v342_v3, %v341_v59  ;;  %v358_v9 = vadd.f32 %v357_v4, %v356_v60  ;;  %v381_v13 = vrot.slane %v380_v6, 1  ;;  %v393_v14 = vsel %vm316_vm0, %v392_v7, 0.0 }
  0x44   : > { %744 = dma.vmem_to_hbm [thread:$0]  (%p1114_p9), %s1238_s10, 64, %s504_s11, %s1252_s12, %s1032_s21, %s1032_s21, %s1033_s18   ;;  %v323_v15 = vadd.f32 %v322_v8, %v321_v62  ;;  %v394_v17 = vrot.slane %v393_v14, 4  ;;  %v416_v18 = vrot.slane %v415_v10, 4  ;;  %v432_v19 = vsel %vm316_vm0, %v431_v11, 0.0 }
  0x45   : > { %v712_v16 = vld [vmem:[%s1197_s7 + $0x1] sm:$0x1]  ;;  %v344_v20 = vadd.f32 %v343_v5, %v336_v2  ;;  %v359_v21 = vrot.slane %v358_v9, 1  ;;  %v382_v22 = vadd.f32 %v381_v13, %v380_v6  ;;  %v433_v23 = vrot.slane %v432_v19, 4  ;;  %v708_v25 = vld [vmem:[%s1180_s27 + $0x1] sm:$0x1]  ;;  %s484_s25 = scalar_lea.hbm %s1368_s2, %s1217_s6  ;;  %s516_s13 = scalar_lea.hbm %s1370_s4, %s1217_s6 }
  0x46   : > { %v324_v24 = vadd.f32 %v323_v15, %v314_v0  ;;  %v395_v26 = vadd.f32 %v394_v17, %v393_v14  ;;  %v417_v27 = vadd.f32 %v416_v18, %v415_v10  ;;  %v455_v28 = vrot.slane %v454_v12, 4  ;;  %v716_v44 = vld [vmem:[%s1180_s27 + $0x2] sm:$0x1]  ;;  %v720_v45 = vld [vmem:[%s1197_s7 + $0x2] sm:$0x1]  ;;  %s485_s24 = sshll.u32 %s1180_s27, 4  ;;  %s486_s24 = int_to_ptr.vmem [resolvable:$true] %s485_s24 }
  0x47   : > { %345 = vst [vmem:[%s1197_s7] sm:$0x1] %v344_v20  ;;  %v360_v29 = vadd.f32 %v359_v21, %v358_v9  ;;  %v383_v30 = vadd.f32 %v712_v16, %v382_v22  ;;  %v434_v31 = vadd.f32 %v433_v23, %v432_v19  ;;  %v724_v49 = vld [vmem:[%s1180_s27 + $0x3] sm:$0x1]  ;;  %v728_v52 = vld [vmem:[%s1197_s7 + $0x3] sm:$0x1]  ;;  %s1295_s0 = sshll.u32 %s484_s25, 4  ;;  %s488_s0 = int_to_ptr.hbm [resolvable:$true] %s1295_s0 }
  0x48   : > { %325 = vst [vmem:[%s1180_s27] sm:$0x1] %v324_v24  ;;  %v396_v32 = vrot.slane %v395_v26, 2  ;;  %v418_v33 = vrot.slane %v417_v27, 2  ;;  %v456_v34 = vadd.f32 %v455_v28, %v454_v12  ;;  %s1297_s23 = sshll.u32 %s516_s13, 4  ;;  %s517_s5 = sshll.u32 %s1197_s7, 4  ;;  %s1304_s5 = int_to_ptr.vmem [resolvable:$true] %s517_s5  ;;  %s520_s23 = int_to_ptr.hbm [resolvable:$true] %s1297_s23 }
  0x49   : > { %v361_v35 = vadd.f32 %v708_v25, %v360_v29  ;;  %713 = vst [vmem:[%s1197_s7 + $0x1] sm:$0x1] %v383_v30  ;;  %v435_v36 = vrot.slane %v434_v31, 2  ;;  %s464_s6 = scalar_lea.sflag [#allocation4], %s1151_s22  ;;  %s923_s14 = sshra.s32 %s488_s0, 4  ;;  %s924_s14 = int_to_ptr.hbm [resolvable:$true] %s923_s14 }
  0x4a   : > { %v397_v37 = vadd.f32 %v396_v32, %v395_v26  ;;  %v419_v38 = vadd.f32 %v418_v33, %v417_v27  ;;  %v457_v39 = vrot.slane %v456_v34, 2  ;;  %s925_s26 = scalar_lea.hbm %s924_s14, 4  ;;  %s929_s25 = scalar_lea.hbm %s1368_s2, 8 }
  0x4b   : > { %709 = vst [vmem:[%s1180_s27 + $0x1] sm:$0x1] %v361_v35  ;;  %v436_v40 = vadd.f32 %v435_v36, %v434_v31  ;;  %p926_p0 = scmp.ne.s32.totalorder %s924_s14, %s925_s26  ;;  %p930_p3 = scmp.lt.s32.totalorder %s924_s14, %s1368_s2 }
  0x4c   : > { %v398_v41 = vrot.slane %v397_v37, 1  ;;  %v420_v42 = vrot.slane %v419_v38, 1  ;;  %v458_v43 = vadd.f32 %v457_v39, %v456_v34  ;;  %p931_p4 = scmp.lt.s32.totalorder %s929_s25, %s925_s26 }
  0x4d   : > { %v437_v46 = vrot.slane %v436_v40, 1  ;;  %p927_p1 = pnand %p926_p0, %p1114_p9 }
  0x4e   : > { %v399_v47 = vadd.f32 %v398_v41, %v397_v37  ;;  %v421_v48 = vadd.f32 %v420_v42, %v419_v38  ;;  %v459_v50 = vrot.slane %v458_v43, 1  ;;  %p932_p5 = por %p931_p4, %p930_p3 }
  0x4f   : > { %v438_v51 = vadd.f32 %v437_v46, %v436_v40  ;;  %p928_p2 = pneg %p927_p1 }
  0x50   : > { %v400_v53 = vadd.f32 %v716_v44, %v399_v47  ;;  %v422_v54 = vadd.f32 %v720_v45, %v421_v48  ;;  %v460_v55 = vadd.f32 %v459_v50, %v458_v43 }
  0x51   : > { %v439_v56 = vadd.f32 %v724_v49, %v438_v51  ;;  %p933_p6 = pnand %p932_p5, %p928_p2 }
  0x52   : > { %717 = vst [vmem:[%s1180_s27 + $0x2] sm:$0x1] %v400_v53  ;;  %v461_v57 = vadd.f32 %v728_v52, %v460_v55 }
  0x53   : > { %721 = vst [vmem:[%s1197_s7 + $0x2] sm:$0x1] %v422_v54 }
  0x54   : > { %725 = vst [vmem:[%s1180_s27 + $0x3] sm:$0x1] %v439_v56 }
  0x55   : > { %729 = vst [vmem:[%s1197_s7 + $0x3] sm:$0x1] %v461_v57 }
  0x56   : > { %936 = shalt.err (!%p933_p6)
}
  0x57   : > { %743 = dma.vmem_to_hbm [thread:$0]  (%p1114_p9), %s486_s24, 64, %s488_s0, %s464_s6, %s1032_s21, %s1032_s21, %s1033_s18  }
  0x58   : > { %s951_s22 = sshra.s32 %s520_s23, 4  ;;  %s957_s14 = scalar_lea.hbm %s1370_s4, 8  ;;  %s952_s22 = int_to_ptr.hbm [resolvable:$true] %s951_s22 }
  0x59   : > { %s953_s27 = scalar_lea.hbm %s952_s22, 4  ;;  %p958_p13 = scmp.lt.s32.totalorder %s952_s22, %s1370_s4 }
  0x5a   : > { %p954_p7 = scmp.ne.s32.totalorder %s952_s22, %s953_s27  ;;  %p959_p0 = scmp.lt.s32.totalorder %s957_s14, %s953_s27 }
  0x5c   : > { %p955_p8 = pnand %p954_p7, %p1114_p9  ;;  %p960_p1 = por %p959_p0, %p958_p13 }
  0x5e   : > { %p956_p10 = pneg %p955_p8 }
  0x60   : > { %p961_p2 = pnand %p960_p1, %p956_p10 }
  0x62   : > { %964 = shalt.err (!%p961_p2)
}
  0x63   : > { %745 = dma.vmem_to_hbm [thread:$0]  (%p1114_p9), %s1304_s5, 64, %s520_s23, %s1252_s12, %s1032_s21, %s1032_s21, %s1033_s18  }
  0x64 PF: > { %s534_s24 = sand.u32 1, %s1007_s15   ;;  %p757_p3 = pnand %p693_p12, %p1123_p11 }
  0x65   : > { %s535_s0 = scalar_lea.sflag [#allocation4], %s534_s24 }
  0x66   : > { %p758_p4 = pneg %p757_p3 }
  0x68   : > { %998 = dma.done.wait (%p758_p4), %s535_s0, 64  }
  0x69   : > { %1000 = vsyncadd (%p758_p4), %s535_s0, 4294967232  ;;  %s1381_s28 = sadd.s32 4294967294, %s1027_s20  }
  0x6a   : > { %s544_s6 = sand.u32 1, %s1381_s28  }
  0x6b   : > { %s545_s9 = scalar_lea.sflag [#allocation9], %s544_s6 }
  0x6c   : > { %1002 = dma.done.wait (%p758_p4), %s545_s9, 128  }
  0x6d   : > { %1004 = vsyncadd (%p758_p4), %s545_s9, 4294967168  ;;  %s27_s20 = sadd.s32 1, %s1027_s20   ;;  %s1382_s30 = sld [smem:[#allocation15_spill]] }
  0x6e   : > { %p24_p9 = scmp.ge.s32.totalorder %s27_s20, 4   ;;  %s1383_s15 = smov %s1011_s16 }
  0x6f   : > { %s1384_s16 = smov %s1015_s17  ;;  %s1385_s17 = smov %s1121_s29 }
  0x70   : > { %s1386_s18 = smov %s1023_s19  ;;  %26 = sbr.rel (!%p24_p9) target bundleno = 12 (0xc), region = 134 }
  0x73   : > { %s1387_s19 = smov %s1382_s30 }
  0x75   :  { %561 = vsyncpa [#allocation3], 1 }
  0x76   :  { %563 = vsyncpa [#allocation3 + $0x1], 1 }
  0x77   :  { %564 = vsyncpa [#allocation6], 1 }
  0x78   :  { %566 = vsyncpa [#allocation6 + $0x1], 1 }
  0x79   :  { %567 = vsyncpa [#allocation4], 1 }
  0x7a   :  { %569 = vsyncpa [#allocation4 + $0x1], 1 }
  0x7b   :  { %570 = vsyncpa [#allocation9], 1 }
  0x7c   :  { %572 = vsyncpa [#allocation9 + $0x1], 1 }

</bundles_post_ra>
